<compile_context>
chip_gen: v7x
topology: tpu7x:2x2x1
jax: 0.10.0
libtpu: 0.0.40
codegen_flags: <defaults>
</compile_context>

<pallas_src>
import math

import jax
import jax.numpy as jnp
from jax import lax
from jax.experimental import pallas as pl
from jax.experimental.pallas import tpu as pltpu


def _sinusoid_pe_kernel(inv_freq_ref, phase_ref, o_ref):
    # inv_freq_ref, phase_ref: (1, Dp) f32 in VMEM (lane-indexed constants)
    # o_ref: (TILE_S, Dp) f32 output tile
    tile_s, _ = o_ref.shape
    row0 = (pl.program_id(0) * tile_s).astype(jnp.float32)
    pos = row0 + lax.broadcasted_iota(jnp.int32, o_ref.shape, 0).astype(jnp.float32)
    # even lanes: sin(pos * inv_freq); odd lanes: cos(...) == sin(... + pi/2)
    o_ref[...] = jnp.sin(pos * inv_freq_ref[...] + phase_ref[...])


def _round_up(n: int, m: int) -> int:
    return ((n + m - 1) // m) * m


def sinusoid_positional_encoding(x: jax.Array, d_model: int, *, tile_s: int = 512) -> jax.Array:
    """Returns pe[:x.shape[0]] with shape [seq_len, 1, d_model], float32."""
    seq_len = int(x.shape[0])

    # Lane-dense (multiple of 128) output slab; sublane tile a multiple of 8.
    d_pad = _round_up(max(d_model, 128), 128)
    tile_s = max(8, min(_round_up(tile_s, 8), _round_up(seq_len, 8)))
    s_pad = _round_up(seq_len, tile_s)
    n_tiles = s_pad // tile_s

    # Hoisted per-lane constants (computed once in the wrapper, tiny).
    lane = jnp.arange(d_pad, dtype=jnp.int32)
    pair = (lane // 2).astype(jnp.float32)
    inv_freq = jnp.exp(pair * (-2.0 * math.log(10000.0) / float(d_model)))[None, :]
    phase = ((lane % 2).astype(jnp.float32) * (math.pi / 2.0))[None, :]

    pe_2d = pl.pallas_call(
        _sinusoid_pe_kernel,
        out_shape=jax.ShapeDtypeStruct((s_pad, d_pad), jnp.float32),
        grid=(n_tiles,),
        in_specs=[
            pl.BlockSpec((1, d_pad), lambda i: (0, 0)),
            pl.BlockSpec((1, d_pad), lambda i: (0, 0)),
        ],
        out_specs=pl.BlockSpec((tile_s, d_pad), lambda i: (i, 0)),
        compiler_params=pltpu.CompilerParams(
            dimension_semantics=("parallel",),
        ),
    )(inv_freq, phase)

    # Strip the padding and add the singleton "batch" axis to match PyTorch.
    return pe_2d[:seq_len, :d_model].reshape(seq_len, 1, d_model)


def _reference_pe(seq_len: int, d_model: int) -> jnp.ndarray:
    # Pure-JAX reference mirroring the PyTorch __init__ construction.
    position = jnp.arange(seq_len, dtype=jnp.float32)[:, None]
    div_term = jnp.exp(
        jnp.arange(0, d_model, 2, dtype=jnp.float32)
        * (-math.log(10000.0) / d_model)
    )
    pe = jnp.zeros((seq_len, 1, d_model), dtype=jnp.float32)
    pe = pe.at[:, 0, 0::2].set(jnp.sin(position * div_term))
    pe = pe.at[:, 0, 1::2].set(jnp.cos(position * div_term))
    return pe


if __name__ == "__main__":
    # Small shapes consistent with the module (module-level d_model = 128);
    # tile_s=16 gives a 4-step grid so the pipelined/tiled path is exercised.
    seq_len, batch, d_model = 64, 2, 128
    key = jax.random.PRNGKey(0)
    x = jax.random.normal(key, (seq_len, batch, d_model), dtype=jnp.float32)

    out = sinusoid_positional_encoding(x, d_model, tile_s=16)
    out = jax.block_until_ready(out)

    ref = _reference_pe(seq_len, d_model)
    assert out.shape == (seq_len, 1, d_model), out.shape
    assert jnp.allclose(out, ref, atol=1e-4, rtol=1e-4), float(
        jnp.max(jnp.abs(out - ref))
    )

    print("KERNEL_OK")
</pallas_src>

<mosaic_0001>
module attributes {stable_mosaic.version = 11 : i64} {
  func.func @_sinusoid_pe_kernel(%arg0: i32, %arg1: memref<1x128xf32, #tpu.memory_space<vmem>>, %arg2: memref<1x128xf32, #tpu.memory_space<vmem>>, %arg3: memref<16x128xf32, #tpu.memory_space<vmem>>) attributes {dimension_semantics = [#tpu.dimension_semantics<parallel>], iteration_bounds = array<i64: 4>, scalar_prefetch = 0 : i64, scratch_operands = 0 : i64, tpu.core_type = #tpu.core_type<tc>, window_params = [{pipeline_mode = #tpu.pipeline_mode<synchronous>, transform_indices = @transform_0, window_bounds = array<i64: 1, 128>}, {pipeline_mode = #tpu.pipeline_mode<synchronous>, transform_indices = @transform_1, window_bounds = array<i64: 1, 128>}, {transform_indices = @transform_2, window_bounds = array<i64: 16, 128>}]} {
    %c16_i32 = arith.constant 16 : i32
    %0 = arith.muli %arg0, %c16_i32 : i32
    %1 = arith.sitofp %0 : i32 to f32
    %2 = tpu.iota {dimensions = array<i32: 0>} : vector<16x128xi32>
    %3 = arith.sitofp %2 : vector<16x128xi32> to vector<16x128xf32>
    %4 = vector.broadcast %1 : f32 to vector<16x128xf32>
    %5 = arith.addf %4, %3 : vector<16x128xf32>
    %c0 = arith.constant 0 : index
    %c0_0 = arith.constant 0 : index
    %6 = vector.load %arg1[%c0, %c0_0] : memref<1x128xf32, #tpu.memory_space<vmem>>, vector<1x128xf32>
    %7 = vector.broadcast %6 : vector<1x128xf32> to vector<16x128xf32>
    %8 = arith.mulf %5, %7 : vector<16x128xf32>
    %c0_1 = arith.constant 0 : index
    %c0_2 = arith.constant 0 : index
    %9 = vector.load %arg2[%c0_1, %c0_2] : memref<1x128xf32, #tpu.memory_space<vmem>>, vector<1x128xf32>
    %10 = vector.broadcast %9 : vector<1x128xf32> to vector<16x128xf32>
    %11 = arith.addf %8, %10 : vector<16x128xf32>
    %12 = math.sin %11 : vector<16x128xf32>
    %c0_3 = arith.constant 0 : index
    %c0_4 = arith.constant 0 : index
    %13 = vector.load %arg3[%c0_3, %c0_4] : memref<16x128xf32, #tpu.memory_space<vmem>>, vector<16x128xf32>
    tpu.vector_store %arg3[%c0_3, %c0_4], %12 {strides = array<i32>} : memref<16x128xf32, #tpu.memory_space<vmem>>, vector<16x128xf32>,
    return
  }
  func.func @transform_0(%arg0: i32) -> (i32, i32) {
    %c0_i32 = arith.constant 0 : i32
    %c0_i32_0 = arith.constant 0 : i32
    %c0_i32_1 = arith.constant 0 : i32
    return %c0_i32, %c0_i32_0 : i32, i32
  }
  func.func @transform_1(%arg0: i32) -> (i32, i32) {
    %c0_i32 = arith.constant 0 : i32
    %c0_i32_0 = arith.constant 0 : i32
    %c0_i32_1 = arith.constant 0 : i32
    return %c0_i32, %c0_i32_0 : i32, i32
  }
  func.func @transform_2(%arg0: i32) -> (i32, i32) {
    %c0_i32 = arith.constant 0 : i32
    %c0_i32_0 = arith.constant 0 : i32
    return %arg0, %c0_i32 : i32, i32
  }
}

</mosaic_0001>

<bundles_post_ra>
// kernel: tpu_custom_call.1
= control target key start
LH: loop header
LB: loop body
LE: loop exit
PB: predicated region body
PF: predicated region fallthrough
CT: control target
= control target key end

     0   :  { %7 = vsyncpa [#allocation3], 0  ;;  %s885_s0 = inlined_call_operand.hbm [shape: f32[1,128], index: 0, kind: input, shape index: {}]   ;;  %s886_s1 = inlined_call_operand.vmem [shape: f32[1,128], index: 1, kind: input, shape index: {}]   ;;  %s887_s2 = inlined_call_operand.hbm [shape: f32[64,128], index: 2, kind: output, shape index: {}]  }
   0x1   :  { %8 = vsyncpa [#allocation4], 0 }
   0x2   :  { %10 = vsyncpa [#allocation4 + $0x1], 0  ;;  %s668_s9 = smov 0   ;;  %s670_s10 = smov 0  }
   0x3   :  { %s672_s11 = smov 0   ;;  %s674_s12 = smov 0  }
   0x4 LB: > { %s689_s13 = sadd.s32 4294967295, %s641_s12   ;;  %s450_s14 = sadd.s32 4294967294, %s641_s12   ;;  %s641_s12 = sphi %s674_s12, %s905_s12   ;;  %s637_s11 = sphi %s672_s11, %s904_s11   ;;  %s633_s10 = sphi %s670_s10, %s903_s10   ;;  %s629_s9 = sphi %s668_s9, %s902_s9  }
   0x5   : > { %s693_s15 = sadd.s32 1, %s641_s12   ;;  %s65_s16 = sadd.s32 1, %s637_s11 }
   0x6   : > { %s62_s17 = ssub.s32 %s641_s12, %s693_s15  ;;  %p75_p0 = scmp.ne.s32.totalorder %s637_s11, %s633_s10 }
   0x7   : > { %p63_p1 = scmp.eq.s32.totalorder %s62_s17, 0  ;;  %p76_p2 = scmp.eq.s32.totalorder %s689_s13, 3 }
   0x8   : > { %p81_p3 = scmp.ne.s32.totalorder %s633_s10, %s629_s9  ;;  %p82_p4 = scmp.eq.s32.totalorder %s450_s14, 3 }
   0x9   : > { %s704_s18 = scalar_select %p63_p1, %s637_s11, %s65_s16  }
   0xa   : > { %p706_p5 = por %p76_p2, %p75_p0  ;;  %p710_p6 = por %p82_p4, %p81_p3 }
   0xb   : > { %p451_p7 = scmp.ge.s32.totalorder %s641_s12, 1  ;;  %p89_p8 = scmp.lt.s32.totalorder %s641_s12, 5 }
   0xc   : > { %s891_s19 = scalar_select %p706_p5, 1, 0 }
   0xd   : > { %s892_s20 = scalar_select %p710_p6, 1, 0 }
   0xe   : > { %p888_p9 = scmp.eq.s32.totalorder %s689_s13, 0  ;;  %p717_p10 = pnand %p451_p7, %p89_p8 }
   0xf   : > { %s643_s22 = smov [#allocation2]   ;;  %s547_s27 = scalar_lea.hbm %s885_s0, 16 }
  0x10   : > { %s893_s21 = scalar_select %p717_p10, 1, 0 }
  0x11   : > { %s102_s23 = sshll.u32 %s643_s22, 4  ;;  %p487_p11 = pneg %p717_p10  ;;  %s103_s23 = int_to_ptr.vmem [resolvable:$true] %s102_s23 }
  0x12   : > { %p548_p13 = scmp.ne.s32.totalorder %s885_s0, %s547_s27  ;;  %p554_p3 = scmp.lt.u32.totalorder %s547_s27, %s885_s0 }
  0x13   : > { %p725_p12 = pnand %p888_p9, %p487_p11 }
  0x15   : > { %p549_p0 = pneg %p725_p12 }
  0x17   : > { %p550_p1 = pnand %p549_p0, %p548_p13 }
  0x19   : > { %p551_p2 = pneg %p550_p1 }
  0x1b   : > { %p556_p4 = pnand %p554_p3, %p551_p2 }
  0x1d   : > { %559 = shalt.err (!%p556_p4)
}
  0x1e   : > { %s560_s4 = scalar_lea.vmem %s103_s23, 16  ;;  %s567_s5 = scalar_lea.vmem %s103_s23, 32 }
  0x1f   : > { %p561_p7 = scmp.ne.s32.totalorder %s103_s23, %s560_s4  ;;  %p568_p9 = scmp.lt.s32.totalorder %s103_s23, %s103_s23 }
  0x20   : > { %p569_p6 = scmp.lt.s32.totalorder %s567_s5, %s560_s4 }
  0x21   : > { %p563_p8 = pnand %p561_p7, %p549_p0 }
  0x22   : > { %p570_p5 = por %p569_p6, %p568_p9 }
  0x23   : > { %p564_p11 = pneg %p563_p8 }
  0x25   : > { %p571_p10 = pnand %p570_p5, %p564_p11 }
  0x27   : > { %574 = shalt.err (!%p571_p10)
}
  0x28   : > { %490 = dma.hbm_to_vmem [thread:$0]  (!%p725_p12), %s885_s0, 16, %s103_s23, [#allocation3]  }
  0x29   : > { %p895_p13 = scmp.ne.s32.totalorder %s893_s21, 0 }
  0x2a   : > { %p896_p1 = scmp.eq.s32.totalorder (!%p895_p13), %s689_s13, 0 }
  0x2b   : > { %118 = sbr.rel (%p895_p13) target bundleno = 168 (0xa8), region = 28 }
  0x32   : > { %620 = dma.done.wait (%p896_p1), [#allocation3], 16   ;;  %p897_p0 = pmov %p896_p1 }
  0x33   : > { %s456_s8 = sshll.u32 %s689_s13, 4  ;;  %v138_v0 = vlaneseq  ;;  %v457_v7 = vld [vmem:[#allocation2] ss:$0 sm:$0xff]  ;;  %v644_v33 = vmov 683565275   ;;  %s132_s21 = sand.u32 1, %s633_s10  }
  0x34   : > { %622 = vsyncadd (%p897_p0), [#allocation3], 4294967280  ;;  %s137_s14 = scvt.s32.f32 %s456_s8  ;;  %v458_v8 = vld [vmem:[%s886_s1] ss:$0 sm:$0xff]  ;;  %v645_v35 = vmov 2475754826  }
  0x35   : > { %v139_v1 = vshrl.u32 %v138_v0, 7  ;;  %v646_v37 = vmov 2131351028   ;;  %v647_v39 = vmov 2102212464   ;;  %s455_s22 = sshll.u32 %s132_s21, 4 }
  0x36   : > { %v143_v2 = vstv %s137_s14  ;;  %v648_v41 = vmov 920167782   ;;  %v649_v48 = vmov 1326507024   ;;  %s134_s23 = scalar_lea.vmem [#allocation5], %s455_s22  ;;  %s472_s25 = sshll.u32 %s689_s13, 8 }
  0x37   : > { %v141_v3 = vcvt.s32.f32 %v139_v1  ;;  %v140_v4 = vadd.s32 8, %v139_v1  ;;  %s388_s24 = sshll.u32 %s134_s23, 4  ;;  %s840_s28 = scalar_lea.hbm %s887_s2, %s472_s25  ;;  %s835_s24 = int_to_ptr.vmem [resolvable:$true] %s388_s24 }
  0x38   : > { %s844_s13 = scalar_lea.sflag [#allocation4], %s132_s21  ;;  %s575_s29 = scalar_lea.vmem %s835_s24, 256 }
  0x39   : > { %v144_v5 = vadd.f32 %v143_v2, %v141_v3  ;;  %v142_v6 = vcvt.s32.f32 %v140_v4  ;;  %p576_p5 = scmp.ne.s32.totalorder %s835_s24, %s575_s29  ;;  %p900_p6 = scmp.ne.s32.totalorder %s891_s19, 0 }
  0x3a   : > { %s650_s30 = smov [#allocation5]  }
  0x3b   : > { %v153_v9 = vmul.f32 %v457_v7, %v144_v5  ;;  %v145_v10 = vadd.f32 %v143_v2, %v142_v6  ;;  %p577_p9 = pnand %p576_p5, %p900_p6  ;;  %s579_s3 = sshll.u32 %s650_s30, 4  ;;  %s580_s3 = int_to_ptr.vmem [resolvable:$false] %s579_s3 }
  0x3c   : > { %s581_s4 = scalar_lea.vmem %s580_s3, 512  ;;  %p582_p12 = scmp.lt.s32.totalorder %s835_s24, %s580_s3 }
  0x3d   : > { %v755_v11 = vadd.f32 %v458_v8, %v153_v9  ;;  %v154_v12 = vmul.f32 %v457_v7, %v145_v10  ;;  %p578_p10 = pneg %p577_p9  ;;  %p583_p2 = scmp.lt.s32.totalorder %s581_s4, %s575_s29 }
  0x3f   : > { %v164_v13 = vand.u32 2147483647, %v755_v11  ;;  %v167_v14 = vand.u32 2139095040, %v755_v11  ;;  %v759_v15 = vadd.f32 %v458_v8, %v154_v12  ;;  %vm166_vm14 = vcmp.lt.s32.totalorder %v755_v11, 0  ;;  %p584_p3 = por %p583_p2, %p582_p12 }
  0x41   : > { %v168_v16 = vshrl.u32 %v167_v14, 23  ;;  %v171_v17 = vand.u32 8388607, %v164_v13  ;;  %v268_v18 = vand.u32 2147483647, %v759_v15  ;;  %v271_v19 = vand.u32 2139095040, %v759_v15  ;;  %p585_p4 = pnand %p584_p3, %p578_p10 }
  0x42   : > { %vm165_vm15 = vcmp.le.f32.partialorder %v164_v13, 0.7853982 }
  0x43   : > { %v459_v20 = vadd.s32 4294967169, %v168_v16  ;;  %v272_v21 = vshrl.u32 %v271_v19, 23  ;;  %v172_v23 = vor.u32 8388608, %v171_v17  ;;  %v767_v25 = vand.u32 8388607, %v268_v18 }
  0x45   : > { %v174_v22 = vadd.s32 1, %v459_v20  ;;  %v463_v24 = vadd.s32 4294967169, %v272_v21  ;;  %v769_v30 = vshll.u32 %v172_v23, 8  ;;  %v276_v31 = vor.u32 8388608, %v767_v25 }
  0x47   : > { %vm175_vm0 = vcmp.gt.s32.totalorder %v174_v22, 0  ;;  %v278_v27 = vadd.s32 1, %v463_v24 }
  0x48   : > { %v176_v26 = vsel %vm175_vm0, %v174_v22, 0  ;;  %vm270_vm0 = vcmp.lt.s32.totalorder %v759_v15, 0 }
  0x49   : > { %v177_v28 = vshrl.u32 %v176_v26, 5  ;;  %v178_v29 = vand.u32 31, %v176_v26  ;;  %vm279_vm1 = vcmp.gt.s32.totalorder %v278_v27, 0 }
  0x4a   : > { %v280_v53 = vsel %vm279_vm1, %v278_v27, 0  ;;  %vm820_vm1 = vcmp.le.f32.partialorder %v268_v18, 0.7853982 }
  0x4b   : > { %v179_v32 = vsub.s32 32, %v178_v29  ;;  %v181_v34 = vshll.u32 %v644_v33, %v178_v29  ;;  %v184_v36 = vshll.u32 %v645_v35, %v178_v29  ;;  %v187_v38 = vshll.u32 %v646_v37, %v178_v29 }
  0x4c   : > { %v190_v40 = vshll.u32 %v647_v39, %v178_v29  ;;  %v193_v42 = vshll.u32 %v648_v41, %v178_v29  ;;  %vm196_vm2 = vcmp.lt.s32.totalorder %v177_v28, 1  ;;  %vm197_vm3 = vcmp.lt.s32.totalorder %v177_v28, 2 }
  0x4d   : > { %v180_v43 = vshrl.u32 %v644_v33, %v179_v32  ;;  %v182_v44 = vshrl.u32 %v645_v35, %v179_v32  ;;  %v185_v45 = vshrl.u32 %v646_v37, %v179_v32  ;;  %v188_v46 = vshrl.u32 %v647_v39, %v179_v32 }
  0x4e   : > { %v191_v47 = vshrl.u32 %v648_v41, %v179_v32  ;;  %v194_v49 = vshrl.u32 %v649_v48, %v179_v32  ;;  %vm198_vm4 = vcmp.lt.s32.totalorder %v177_v28, 3  ;;  %vm199_vm5 = vcmp.lt.s32.totalorder %v177_v28, 4 }
  0x4f   : > { %v183_v50 = vor.u32 %v182_v44, %v181_v34  ;;  %v186_v51 = vor.u32 %v185_v45, %v184_v36  ;;  %v189_v52 = vor.u32 %v188_v46, %v187_v38  ;;  %v281_v56 = vshrl.u32 %v280_v53, 5 }
  0x50   : > { %v192_v54 = vor.u32 %v191_v47, %v190_v40  ;;  %v195_v55 = vor.u32 %v194_v49, %v193_v42  ;;  %v282_v57 = vand.u32 31, %v280_v53 }
  0x51   : > { %v200_v58 = vsel %vm196_vm2, %v180_v43, %v183_v50  ;;  %v201_v59 = vsel %vm199_vm5, %v189_v52, 2102212464  ;;  %v204_v60 = vsel %vm196_vm2, %v183_v50, %v186_v51  ;;  %v208_v61 = vsel %vm196_vm2, %v186_v51, %v189_v52 }
  0x52   : > { %v202_v62 = vsel %vm198_vm4, %v186_v51, %v201_v59  ;;  %v205_v63 = vsel %vm199_vm5, %v192_v54, 920167782  ;;  %v209_v0 = vsel %vm199_vm5, %v195_v55, 1326507024  ;;  %v283_v1 = vsub.s32 32, %v282_v57 }
  0x53   : > { %v203_v2 = vsel %vm197_vm3, %v200_v58, %v202_v62  ;;  %v206_v3 = vsel %vm198_vm4, %v189_v52, %v205_v63  ;;  %v210_v4 = vsel %vm198_vm4, %v192_v54, %v209_v0  ;;  %v285_v5 = vshll.u32 %v644_v33, %v282_v57 }
  0x54   : > { %v207_v6 = vsel %vm197_vm3, %v204_v60, %v206_v3  ;;  %v211_v7 = vsel %vm197_vm3, %v208_v61, %v210_v4  ;;  %v219_v8 = vmul.u32 %v769_v30, %v203_v2  ;;  %v284_v9 = vshrl.u32 %v644_v33, %v283_v1 }
  0x55   : > { %v784_v10 = vmul.u32.u64.low %v769_v30, %v211_v7  ;;  %v785_v12 = vmul.u32.u64.high %v769_v30, %v211_v7, %v784_v10  ;;  %v788_v14 = vmul.u32.u64.low %v769_v30, %v207_v6  ;;  %v789_v16 = vmul.u32.u64.high %v769_v30, %v207_v6, %v788_v14 }
  0x56   : > { %v286_v17 = vshrl.u32 %v645_v35, %v283_v1  ;;  %v288_v19 = vshll.u32 %v645_v35, %v282_v57  ;;  %v289_v20 = vshrl.u32 %v646_v37, %v283_v1  ;;  %v291_v21 = vshll.u32 %v646_v37, %v282_v57 }
  0x57   : > { %v292_v22 = vshrl.u32 %v647_v39, %v283_v1  ;;  %v294_v23 = vshll.u32 %v647_v39, %v282_v57  ;;  %v295_v24 = vshrl.u32 %v648_v41, %v283_v1  ;;  %v297_v26 = vshll.u32 %v648_v41, %v282_v57 }
  0x58   : > { %v287_v27 = vor.u32 %v286_v17, %v285_v5  ;;  %v290_v28 = vor.u32 %v289_v20, %v288_v19  ;;  %v298_v29 = vshrl.u32 %v649_v48, %v283_v1  ;;  %vm300_vm6 = vcmp.lt.s32.totalorder %v281_v56, 1 }
  0x59   : > { %vm221_vm7 = vc.u32 %v785_v12, %v788_v14  ;;  %v222_v32 = vadd.s32 1, %v789_v16  ;;  %v293_v33 = vor.u32 %v292_v22, %v291_v21  ;;  %v316_v30 = vshll.u32 %v276_v31, 8 }
  0x5a   : > { %v296_v34 = vor.u32 %v295_v24, %v294_v23  ;;  %v299_v35 = vor.u32 %v298_v29, %v297_v26  ;;  %vm301_vm8 = vcmp.lt.s32.totalorder %v281_v56, 2  ;;  %vm302_vm9 = vcmp.lt.s32.totalorder %v281_v56, 3 }
  0x5b   : > { %v223_v36 = vsel %vm221_vm7, %v222_v32, %v789_v16  ;;  %vm303_vm10 = vcmp.lt.s32.totalorder %v281_v56, 4  ;;  %v304_v37 = vsel %vm300_vm6, %v284_v9, %v287_v27  ;;  %v308_v38 = vsel %vm300_vm6, %v287_v27, %v290_v28 }
  0x5c   : > { %v224_v39 = vadd.s32 %v223_v36, %v219_v8  ;;  %v305_v40 = vsel %vm303_vm10, %v293_v33, 2102212464  ;;  %v309_v41 = vsel %vm303_vm10, %v296_v34, 920167782  ;;  %v312_v42 = vsel %vm300_vm6, %v290_v28, %v293_v33 }
  0x5d   : > { %v306_v43 = vsel %vm302_vm9, %v290_v28, %v305_v40  ;;  %v310_v44 = vsel %vm302_vm9, %v293_v33, %v309_v41  ;;  %v313_v25 = vsel %vm303_vm10, %v299_v35, 1326507024  ;;  %v220_v3 = vadd.s32 %v788_v14, %v785_v12 }
  0x5e   : > { %v225_v31 = vadd.s32 536870912, %v224_v39  ;;  %v311_v45 = vsel %vm301_vm8, %v308_v38, %v310_v44  ;;  %v314_v46 = vsel %vm302_vm9, %v296_v34, %v313_v25  ;;  %v307_v47 = vsel %vm301_vm8, %v304_v37, %v306_v43 }
  0x5f   : > { %v315_v48 = vsel %vm301_vm8, %v312_v42, %v314_v46  ;;  %v802_v49 = vmul.u32.u64.low %v316_v30, %v311_v45  ;;  %v803_v50 = vmul.u32.u64.high %v316_v30, %v311_v45, %v802_v49  ;;  %v323_v55 = vmul.u32 %v316_v30, %v307_v47 }
  0x60   : > { %v226_v51 = vshrl.u32 %v225_v31, 30  ;;  %v805_v52 = vmul.u32.u64.low %v316_v30, %v315_v48  ;;  %v806_v53 = vmul.u32.u64.high %v316_v30, %v315_v48, %v805_v52  ;;  %vm256_vm5 = vweird.f32 %v755_v11 }
  0x61   : > { %v326_v57 = vadd.s32 1, %v803_v50  ;;  %vm360_vm9 = vweird.f32 %v759_v15 }
  0x62   : > { %v227_v54 = vshll.u32 %v226_v51, 30  ;;  %vm325_vm11 = vc.u32 %v806_v53, %v802_v49  ;;  %v250_v27 = vsub.s32 4, %v226_v51  ;;  %v324_v12 = vadd.s32 %v802_v49, %v806_v53 }
  0x63   : > { %v327_v59 = vsel %vm325_vm11, %v326_v57, %v803_v50 }
  0x64   : > { %v228_v58 = vsub.s32 %v224_v39, %v227_v54  ;;  %v328_v61 = vadd.s32 %v327_v59, %v323_v55  ;;  %v251_v34 = vsel %vm166_vm14, %v250_v27, %v226_v51 }
  0x65   : > { %v253_v39 = vsel %vm165_vm15, 0, %v251_v34 }
  0x66   : > { %v230_v60 = vsub.s32 0, %v228_v58  ;;  %v329_v62 = vadd.s32 536870912, %v328_v61  ;;  %v257_v44 = vadd.s32 3, %v253_v39 }
  0x68   : > { %v460_v56 = vmin.u32 %v230_v60, %v228_v58  ;;  %v330_v0 = vshrl.u32 %v329_v62, 30  ;;  %v258_v45 = vand.u32 3, %v257_v44 }
  0x6a   : > { %v232_v63 = vclz %v460_v56  ;;  %v331_v2 = vshll.u32 %v330_v0, 30  ;;  %v354_v31 = vsub.s32 4, %v330_v0  ;;  %vm263_vm2 = vcmp.eq.s32.totalorder %v258_v45, 2 }
  0x6b   : > { %vm260_vm3 = vcmp.eq.s32.totalorder %v258_v45, 0  ;;  %vm259_vm4 = vcmp.lt.s32.totalorder %v258_v45, 2 }
  0x6c   : > { %v461_v1 = vadd.s32 4294967294, %v232_v63  ;;  %v332_v5 = vsub.s32 %v328_v61, %v331_v2  ;;  %v355_v48 = vsel %vm270_vm0, %v354_v31, %v330_v0 }
  0x6d   : > { %v357_v52 = vsel %vm820_vm1, 0, %v355_v48 }
  0x6e   : > { %vm462_vm12 = vcmp.lt.s32.totalorder %v461_v1, 0  ;;  %v334_v9 = vsub.s32 0, %v332_v5  ;;  %v361_v57 = vadd.s32 3, %v357_v52 }
  0x6f   : > { %v235_v4 = vsel %vm462_vm12, 0, %v461_v1 }
  0x70   : > { %v236_v6 = vsub.s32 32, %v235_v4  ;;  %v237_v7 = vshll.u32 %v228_v58, %v235_v4  ;;  %v240_v8 = vsub.s32 4294967266, %v235_v4  ;;  %v464_v17 = vmin.u32 %v334_v9, %v332_v5 }
  0x71   : > { %v362_v61 = vand.u32 3, %v361_v57 }
  0x72   : > { %v238_v10 = vshrl.u32 %v220_v3, %v236_v6  ;;  %v241_v16 = vadd.s32 127, %v240_v8  ;;  %v336_v21 = vclz %v464_v17 }
  0x73   : > { %vm367_vm6 = vcmp.eq.s32.totalorder %v362_v61, 2  ;;  %vm364_vm7 = vcmp.eq.s32.totalorder %v362_v61, 0  ;;  %vm363_vm8 = vcmp.lt.s32.totalorder %v362_v61, 2 }
  0x74   : > { %v239_v19 = vor.u32 %v238_v10, %v237_v7  ;;  %v242_v20 = vshll.u32 %v241_v16, 23  ;;  %v465_v24 = vadd.s32 4294967294, %v336_v21 }
  0x76   : > { %v243_v22 = vor.u32 4788187, %v242_v20  ;;  %v246_v23 = vcvt.s32.f32 %v239_v19  ;;  %vm466_vm13 = vcmp.lt.s32.totalorder %v465_v24, 0 }
  0x77   : > { %v339_v28 = vsel %vm466_vm13, 0, %v465_v24 }
  0x78   : > { %v244_v26 = vand.u32 2147483647, %v243_v22  ;;  %v340_v29 = vsub.s32 32, %v339_v28  ;;  %v341_v32 = vshll.u32 %v332_v5, %v339_v28  ;;  %v344_v33 = vsub.s32 4294967266, %v339_v28 }
  0x7a   : > { %v247_v14 = vmul.f32 %v246_v23, %v244_v26  ;;  %v342_v35 = vshrl.u32 %v324_v12, %v340_v29  ;;  %v345_v36 = vadd.s32 127, %v344_v33 }
  0x7c   : > { %v248_v30 = vxor.u32 2147483648, %v247_v14  ;;  %v343_v40 = vor.u32 %v342_v35, %v341_v32  ;;  %v346_v41 = vshll.u32 %v345_v36, 23 }
  0x7e   : > { %v249_v37 = vsel %vm166_vm14, %v248_v30, %v247_v14  ;;  %v347_v42 = vor.u32 4788187, %v346_v41  ;;  %v350_v43 = vcvt.s32.f32 %v343_v40 }
  0x7f   : > { %v252_v38 = vsel %vm165_vm15, %v755_v11, %v249_v37 }
  0x80   : > { %539 = vcosq.f32 %v252_v38  ;;  %v348_v25 = vand.u32 2147483647, %v347_v42 }
  0x81   : > { %541 = vsinq.f32 %v252_v38 }
  0x82   : > { %v351_v13 = vmul.f32 %v350_v43, %v348_v25 }
  0x84   : > { %v352_v47 = vxor.u32 2147483648, %v351_v13 }
  0x86   : > { %v353_v49 = vsel %vm270_vm0, %v352_v47, %v351_v13 }
  0x87   : > { %v356_v51 = vsel %vm820_vm1, %v759_v15, %v353_v49 }
  0x88   : > { %543 = vcosq.f32 %v356_v51 }
  0x89   : > { %545 = vsinq.f32 %v356_v51 }
  0x8a   : > { %v540_v50 = vpop.eup %539 }
  0x8b   : > { %v542_v53 = vpop.eup %541  ;;  %v264_v18 = vxor.u32 2147483648, %v540_v50 }
  0x8c   : > { %v261_v54 = vxor.u32 2147483648, %v542_v53 }
  0x8d   : > { %v265_v55 = vsel %vm263_vm2, %v264_v18, %v542_v53 }
  0x8e   : > { %v262_v58 = vsel %vm260_vm3, %v540_v50, %v261_v54 }
  0x8f   : > { %v266_v59 = vsel %vm259_vm4, %v262_v58, %v265_v55 }
  0x90   : > { %v267_v60 = vsel %vm256_vm5, nan, %v266_v59 }
  0x91   : > { %372 = vst [vmem:[%s134_s23] sm:$0xff] %v267_v60 }
  0x92   : > { %v544_v56 = vpop.eup %543 }
  0x93   : > { %v546_v62 = vpop.eup %545  ;;  %v368_v63 = vxor.u32 2147483648, %v544_v56 }
  0x94   : > { %v365_v0 = vxor.u32 2147483648, %v546_v62 }
  0x95   : > { %v369_v11 = vsel %vm367_vm6, %v368_v63, %v546_v62 }
  0x96   : > { %v366_v1 = vsel %vm364_vm7, %v544_v56, %v365_v0 }
  0x97   : > { %v370_v2 = vsel %vm363_vm8, %v366_v1, %v369_v11 }
  0x98   : > { %v371_v3 = vsel %vm360_vm9, nan, %v370_v2 }
  0x99   : > { %373 = vst [vmem:[%s134_s23 + $0x8] sm:$0xff] %v371_v3 }
  0x9a   : > { %588 = shalt.err (!%p585_p4)
}
  0x9b   : > { %s589_s5 = scalar_lea.hbm %s840_s28, 256  ;;  %s593_s8 = scalar_lea.hbm %s887_s2, 1024 }
  0x9c   : > { %p590_p7 = scmp.ne.s32.totalorder %s840_s28, %s589_s5  ;;  %p594_p13 = scmp.lt.u32.totalorder %s840_s28, %s887_s2 }
  0x9d   : > { %p595_p1 = scmp.lt.u32.totalorder %s593_s8, %s589_s5  ;;  %p597_p5 = scmp.lt.u32.totalorder %s589_s5, %s840_s28 }
  0x9e   : > { %p591_p8 = pnand %p590_p7, %p900_p6 }
  0x9f   : > { %p596_p0 = por %p595_p1, %p594_p13 }
  0xa0   : > { %p592_p11 = pneg %p591_p8 }
  0xa1   : > { %p598_p9 = por %p597_p5, %p596_p0 }
  0xa3   : > { %p599_p10 = pnand %p598_p9, %p592_p11 }
  0xa5   : > { %602 = shalt.err (!%p599_p10)
}
  0xa6   : > { %s651_s17 = smov 128   ;;  %s652_s21 = smov 8  }
  0xa7   : > { %485 = dma.vmem_to_hbm [thread:$0]  (%p900_p6), %s835_s24, 256, %s840_s28, %s844_s13, %s651_s17, %s651_s17, %s652_s21  }
  0xa8 PF: > { %p497_p12 = scmp.ge.s32.totalorder %s641_s12, 2  ;;  %s403_s22 = sand.u32 1, %s629_s9  }
  0xa9   : > { %p901_p2 = scmp.ne.s32.totalorder %s892_s20, 0  ;;  %s404_s23 = scalar_lea.sflag [#allocation4], %s403_s22 }
  0xab   : > { %p492_p3 = pnand %p497_p12, %p901_p2 }
  0xad   : > { %624 = dma.done.wait (!%p492_p3), %s404_s23, 256  }
  0xae   : > { %626 = vsyncadd (!%p492_p3), %s404_s23, 4294967040  ;;  %p13_p4 = scmp.ge.s32.totalorder %s693_s15, 6   ;;  %s902_s9 = smov %s633_s10 }
  0xaf   : > { %s903_s10 = smov %s637_s11  ;;  %s904_s11 = smov %s704_s18 }
  0xb0   : > { %s905_s12 = smov %s693_s15  ;;  %15 = sbr.rel (!%p13_p4) target bundleno = 4 (0x4), region = 65 }
  0xb7   :  { %409 = vsyncpa [#allocation3], 1 }
  0xb8   :  { %411 = vsyncpa [#allocation3 + $0x1], 1 }
  0xb9   :  { %412 = vsyncpa [#allocation4], 1 }
  0xba   :  { %414 = vsyncpa [#allocation4 + $0x1], 1 }

</bundles_post_ra>
